<compile_context>
chip_gen: v7x
topology: tpu7x:2x2x1
jax: 0.10.0
libtpu: 0.0.40
codegen_flags: <defaults>
</compile_context>

<pallas_src>
import functools

import jax
import jax.numpy as jnp
from jax.experimental import pallas as pl
from jax.experimental.pallas import tpu as pltpu


def attention_kernel(x_ref, wqkv_ref, wout_ref, bout_ref, o_ref, *,
                     heads, dim_head, seq_len):
    # x_ref    : (tb*n, dim)        block of flattened (b*p*n) rows
    # wqkv_ref : (dim, 3*inner)     packed qkv weight, softmax scale folded into q
    # wout_ref : (inner, dim)
    # bout_ref : (1, dim)
    # o_ref    : (tb*n, dim)
    rows, dim = x_ref.shape
    n = seq_len
    tb = rows // n
    dh = dim_head
    inner = heads * dh
    cdt = x_ref.dtype  # MXU operands in the activation's native dtype

    x2d = x_ref[...]                                            # (rows, dim)

    # --- Packed QKV projection: one MXU contraction, N = 3*inner lanes. ---
    qkv = jnp.dot(x2d, wqkv_ref[...],
                  preferred_element_type=jnp.float32)           # (rows, 3*inner) f32

    out_heads = []
    for h in range(heads):
        # Static lane slices of the packed projection (XLU slot, otherwise idle).
        # The (rows, dh) -> (tb, n, dh) reshape is a pure sublane re-blocking.
        q = qkv[:, h * dh:(h + 1) * dh].astype(cdt).reshape(tb, n, dh)
        k = qkv[:, inner + h * dh: inner + (h + 1) * dh].astype(cdt).reshape(tb, n, dh)
        v = qkv[:, 2 * inner + h * dh: 2 * inner + (h + 1) * dh].astype(cdt).reshape(tb, n, dh)

        # Scaled dot-product scores (scale already folded into wq columns).
        s = jnp.einsum('bqd,bkd->bqk', q, k,
                       preferred_element_type=jnp.float32)      # (tb, n, n) f32
        s = s - jnp.max(s, axis=-1, keepdims=True)
        e = jnp.exp(s)
        denom = jnp.sum(e, axis=-1, keepdims=True)              # (tb, n, 1) f32

        # Unnormalised AV matmul, then normalise on the (n, dh) result:
        # moves the reciprocal multiply off the (n, n) tensor.
        o_un = jnp.einsum('bqk,bkd->bqd', e.astype(cdt), v,
                          preferred_element_type=jnp.float32)   # (tb, n, dh) f32
        o_h = o_un * pl.reciprocal(denom, approx=True)
        out_heads.append(o_h.astype(cdt))

    # Lane-concat heads -> (tb, n, inner), then one fused output projection
    # with K = inner (MXU accumulates across K; no VPU heads-sum).
    out_cat = jnp.concatenate(out_heads, axis=-1).reshape(rows, inner)
    proj = jnp.dot(out_cat, wout_ref[...],
                   preferred_element_type=jnp.float32)          # (rows, dim) f32
    proj = proj + bout_ref[...].astype(jnp.float32)

    o_ref[...] = proj.astype(o_ref.dtype)


def _pick_block_batch(total_b, n, *, max_rows=1024):
    """Pick tb = number of flattened (b*p) slices per grid step.

    Goals: (a) tb*n rows per step large enough to amortise ~0.35us per-step
    overhead and fill the projection-matmul M dim (v5e/v6e have 128 MiB VMEM,
    so default up to 1024 rows), (b) shrink the block when n is large so the
    f32 (n, n) score tiles stay within the v7x scoped-VMEM budget, (c) prefer
    >=2 grid steps with an even count so both v7x TensorCores stay balanced,
    (d) keep tb*n a multiple of 8 (sublane tile) unless the block spans the
    whole array.
    """
    if n >= 512:
        max_rows = 256
    elif n >= 256:
        max_rows = 512
    divisors = [d for d in range(1, total_b + 1) if total_b % d == 0]
    ok_rows = [d for d in divisors if (d * n) % 8 == 0 or d == total_b]
    if not ok_rows:
        return total_b
    fits = [d for d in ok_rows if d * n <= max_rows] or [min(ok_rows)]
    even = [d for d in fits if (total_b // d) >= 2 and (total_b // d) % 2 == 0]
    two_plus = [d for d in fits if (total_b // d) >= 2]
    pool = even or two_plus or fits
    return max(pool)


def attention_forward(x, w_qkv, w_out, b_out, *, heads, dim_head):
    b, p, n, dim = x.shape
    inner = heads * dim_head
    assert w_qkv.shape == (dim, 3 * inner)
    assert w_out.shape == (inner, dim)
    scale = float(dim_head) ** -0.5

    B = b * p
    rows_total = B * n
    xf = x.reshape(rows_total, dim)

    # One-time host-side weight prep (weight transform, not a per-call op):
    # fold the softmax scale into the q columns of the packed qkv weight and
    # cast params to the activation dtype so MXU operands are native.
    w_q_scaled = w_qkv[:, :inner] * scale
    w_qkv_s = jnp.concatenate([w_q_scaled, w_qkv[:, inner:]], axis=-1).astype(x.dtype)
    w_o = w_out.astype(x.dtype)
    b_o = b_out.reshape(1, dim)
    # NOTE: if heads == 1 and dim_head == dim the PyTorch module skips the
    # output projection (Identity); pass identity w_out / zero b_out there.

    tb = _pick_block_batch(B, n)
    rows = tb * n
    grid = (B // tb,)

    kernel = functools.partial(attention_kernel,
                               heads=heads, dim_head=dim_head, seq_len=n)

    out = pl.pallas_call(
        kernel,
        out_shape=jax.ShapeDtypeStruct((rows_total, dim), x.dtype),
        grid=grid,
        in_specs=[
            pl.BlockSpec((rows, dim), lambda i: (i, 0)),
            pl.BlockSpec((dim, 3 * inner), lambda i: (0, 0)),
            pl.BlockSpec((inner, dim), lambda i: (0, 0)),
            pl.BlockSpec((1, dim), lambda i: (0, 0)),
        ],
        out_specs=pl.BlockSpec((rows, dim), lambda i: (i, 0)),
        compiler_params=pltpu.CompilerParams(
            dimension_semantics=("parallel",)),
    )(xf, w_qkv_s, w_o, b_o)

    return out.reshape(b, p, n, dim)


def attention_reference(x, w_qkv, w_out, b_out, *, heads, dim_head):
    """Plain-JAX reference mirroring the PyTorch forward."""
    b, p, n, dim = x.shape
    inner = heads * dim_head
    scale = float(dim_head) ** -0.5
    qkv = jnp.einsum('bpnd,de->bpne', x, w_qkv)
    q, k, v = jnp.split(qkv, 3, axis=-1)

    def to_heads(t):  # 'b p n (h d) -> b p h n d'
        return t.reshape(b, p, n, heads, dim_head).transpose(0, 1, 3, 2, 4)

    q, k, v = map(to_heads, (q, k, v))
    dots = jnp.einsum('bphnd,bphmd->bphnm', q, k) * scale
    attn = jax.nn.softmax(dots, axis=-1)
    out = jnp.einsum('bphnm,bphmd->bphnd', attn, v)
    out = out.transpose(0, 1, 3, 2, 4).reshape(b, p, n, inner)
    return jnp.einsum('bpne,ed->bpnd', out, w_out) + b_out


if __name__ == "__main__":
    # Small shapes consistent with the module's forward: x is (b, p, n, dim)
    b, p, n, dim = 2, 2, 8, 32
    heads, dim_head = 4, 16
    inner = heads * dim_head

    key = jax.random.PRNGKey(0)
    k_x, k_wqkv, k_wout, k_bout = jax.random.split(key, 4)

    x = jax.random.normal(k_x, (b, p, n, dim), dtype=jnp.float32)
    # deterministic synthetic parameters (not a checkpoint load)
    w_qkv = (jax.random.normal(k_wqkv, (dim, 3 * inner), dtype=jnp.float32)
             * (1.0 / jnp.sqrt(dim)))
    w_out = (jax.random.normal(k_wout, (inner, dim), dtype=jnp.float32)
             * (1.0 / jnp.sqrt(inner)))
    b_out = jax.random.normal(k_bout, (dim,), dtype=jnp.float32) * 0.01
    # TODO(synk): nn.Dropout(p=0.0) is the identity in eval mode; no RNG path implemented.

    out = attention_forward(x, w_qkv, w_out, b_out, heads=heads, dim_head=dim_head)
    out = jax.block_until_ready(out)

    ref = attention_reference(x, w_qkv, w_out, b_out, heads=heads, dim_head=dim_head)
    assert out.shape == (b, p, n, dim)
    # approx=True reciprocal (EUP vrcp) loosens softmax-normalisation precision
    # by a few e-4 relative; tolerance widened accordingly.
    err = jnp.max(jnp.abs(out - ref))
    assert jnp.allclose(out, ref, atol=5e-3, rtol=5e-3), f"max abs err {err}"

    print("KERNEL_OK")
</pallas_src>

<mosaic_0001>
module attributes {stable_mosaic.version = 11 : i64} {
  func.func @attention_kernel(%arg0: i32, %arg1: memref<16x32xf32, #tpu.memory_space<vmem>>, %arg2: memref<32x192xf32, #tpu.memory_space<vmem>>, %arg3: memref<64x32xf32, #tpu.memory_space<vmem>>, %arg4: memref<1x32xf32, #tpu.memory_space<vmem>>, %arg5: memref<16x32xf32, #tpu.memory_space<vmem>>) attributes {dimension_semantics = [#tpu.dimension_semantics<parallel>], iteration_bounds = array<i64: 2>, scalar_prefetch = 0 : i64, scratch_operands = 0 : i64, tpu.core_type = #tpu.core_type<tc>, window_params = [{transform_indices = @transform_0, window_bounds = array<i64: 16, 32>}, {pipeline_mode = #tpu.pipeline_mode<synchronous>, transform_indices = @transform_1, window_bounds = array<i64: 32, 192>}, {pipeline_mode = #tpu.pipeline_mode<synchronous>, transform_indices = @transform_2, window_bounds = array<i64: 64, 32>}, {pipeline_mode = #tpu.pipeline_mode<synchronous>, transform_indices = @transform_3, window_bounds = array<i64: 1, 32>}, {transform_indices = @transform_4, window_bounds = array<i64: 16, 32>}]} {
    %c0 = arith.constant 0 : index
    %c0_0 = arith.constant 0 : index
    %0 = vector.load %arg1[%c0, %c0_0] : memref<16x32xf32, #tpu.memory_space<vmem>>, vector<16x32xf32>
    %c0_1 = arith.constant 0 : index
    %c0_2 = arith.constant 0 : index
    %1 = vector.load %arg2[%c0_1, %c0_2] : memref<32x192xf32, #tpu.memory_space<vmem>>, vector<32x192xf32>
    %cst = arith.constant dense<0.000000e+00> : vector<16x192xf32>
    %2 = tpu.matmul %0, %1, %cst {dimension_numbers = #tpu.dot_dimension_numbers<[1], [0], [0], [1], [0, 0, 1, 1], [], []>} : vector<16x32xf32>, vector<32x192xf32>, vector<16x192xf32> -> vector<16x192xf32>
    %3 = vector.extract_strided_slice %2 {offsets = [0, 0], sizes = [16, 16], strides = [1, 1]} : vector<16x192xf32> to vector<16x16xf32>
    %4 = vector.shape_cast %3 : vector<16x16xf32> to vector<2x8x16xf32>
    %5 = vector.extract_strided_slice %2 {offsets = [0, 64], sizes = [16, 16], strides = [1, 1]} : vector<16x192xf32> to vector<16x16xf32>
    %6 = vector.shape_cast %5 : vector<16x16xf32> to vector<2x8x16xf32>
    %7 = vector.extract_strided_slice %2 {offsets = [0, 128], sizes = [16, 16], strides = [1, 1]} : vector<16x192xf32> to vector<16x16xf32>
    %8 = vector.shape_cast %7 : vector<16x16xf32> to vector<2x8x16xf32>
    "tpu.trace_start"() <{level = 10 : i32, message = "bqd,bkd->bqk"}> : () -> ()
    %cst_3 = arith.constant dense<0.000000e+00> : vector<2x8x8xf32>
    %9 = tpu.matmul %4, %6, %cst_3 {dimension_numbers = #tpu.dot_dimension_numbers<[2], [2], [1], [1], [0, 0, 0, 1, 1, 1], [0], [0]>} : vector<2x8x16xf32>, vector<2x8x16xf32>, vector<2x8x8xf32> -> vector<2x8x8xf32>
    "tpu.trace_stop"() : () -> ()
    %cst_4 = arith.constant dense<0xFF800000> : vector<2x8xf32>
    %10 = vector.multi_reduction <maximumf>, %9, %cst_4 [2] : vector<2x8x8xf32> to vector<2x8xf32>
    %11 = vector.shape_cast %10 : vector<2x8xf32> to vector<2x8x1xf32>
    %12 = vector.broadcast %11 : vector<2x8x1xf32> to vector<2x8x8xf32>
    %13 = arith.subf %9, %12 : vector<2x8x8xf32>
    %14 = math.exp %13 : vector<2x8x8xf32>
    %cst_5 = arith.constant dense<0.000000e+00> : vector<2x8xf32>
    %15 = vector.multi_reduction <add>, %14, %cst_5 [2] : vector<2x8x8xf32> to vector<2x8xf32>
    %16 = vector.shape_cast %15 : vector<2x8xf32> to vector<2x8x1xf32>
    "tpu.trace_start"() <{level = 10 : i32, message = "bqk,bkd->bqd"}> : () -> ()
    %cst_6 = arith.constant dense<0.000000e+00> : vector<2x8x16xf32>
    %17 = tpu.matmul %14, %8, %cst_6 {dimension_numbers = #tpu.dot_dimension_numbers<[2], [1], [1], [2], [0, 0, 0, 1, 1, 2], [0], [0]>} : vector<2x8x8xf32>, vector<2x8x16xf32>, vector<2x8x16xf32> -> vector<2x8x16xf32>
    "tpu.trace_stop"() : () -> ()
    %18 = tpu.reciprocal %16 {approx = true} : vector<2x8x1xf32> -> vector<2x8x1xf32>
    %19 = vector.broadcast %18 : vector<2x8x1xf32> to vector<2x8x16xf32>
    %20 = arith.mulf %17, %19 : vector<2x8x16xf32>
    %21 = vector.extract_strided_slice %2 {offsets = [0, 16], sizes = [16, 16], strides = [1, 1]} : vector<16x192xf32> to vector<16x16xf32>
    %22 = vector.shape_cast %21 : vector<16x16xf32> to vector<2x8x16xf32>
    %23 = vector.extract_strided_slice %2 {offsets = [0, 80], sizes = [16, 16], strides = [1, 1]} : vector<16x192xf32> to vector<16x16xf32>
    %24 = vector.shape_cast %23 : vector<16x16xf32> to vector<2x8x16xf32>
    %25 = vector.extract_strided_slice %2 {offsets = [0, 144], sizes = [16, 16], strides = [1, 1]} : vector<16x192xf32> to vector<16x16xf32>
    %26 = vector.shape_cast %25 : vector<16x16xf32> to vector<2x8x16xf32>
    "tpu.trace_start"() <{level = 10 : i32, message = "bqd,bkd->bqk"}> : () -> ()
    %cst_7 = arith.constant dense<0.000000e+00> : vector<2x8x8xf32>
    %27 = tpu.matmul %22, %24, %cst_7 {dimension_numbers = #tpu.dot_dimension_numbers<[2], [2], [1], [1], [0, 0, 0, 1, 1, 1], [0], [0]>} : vector<2x8x16xf32>, vector<2x8x16xf32>, vector<2x8x8xf32> -> vector<2x8x8xf32>
    "tpu.trace_stop"() : () -> ()
    %cst_8 = arith.constant dense<0xFF800000> : vector<2x8xf32>
    %28 = vector.multi_reduction <maximumf>, %27, %cst_8 [2] : vector<2x8x8xf32> to vector<2x8xf32>
    %29 = vector.shape_cast %28 : vector<2x8xf32> to vector<2x8x1xf32>
    %30 = vector.broadcast %29 : vector<2x8x1xf32> to vector<2x8x8xf32>
    %31 = arith.subf %27, %30 : vector<2x8x8xf32>
    %32 = math.exp %31 : vector<2x8x8xf32>
    %cst_9 = arith.constant dense<0.000000e+00> : vector<2x8xf32>
    %33 = vector.multi_reduction <add>, %32, %cst_9 [2] : vector<2x8x8xf32> to vector<2x8xf32>
    %34 = vector.shape_cast %33 : vector<2x8xf32> to vector<2x8x1xf32>
    "tpu.trace_start"() <{level = 10 : i32, message = "bqk,bkd->bqd"}> : () -> ()
    %cst_10 = arith.constant dense<0.000000e+00> : vector<2x8x16xf32>
    %35 = tpu.matmul %32, %26, %cst_10 {dimension_numbers = #tpu.dot_dimension_numbers<[2], [1], [1], [2], [0, 0, 0, 1, 1, 2], [0], [0]>} : vector<2x8x8xf32>, vector<2x8x16xf32>, vector<2x8x16xf32> -> vector<2x8x16xf32>
    "tpu.trace_stop"() : () -> ()
    %36 = tpu.reciprocal %34 {approx = true} : vector<2x8x1xf32> -> vector<2x8x1xf32>
    %37 = vector.broadcast %36 : vector<2x8x1xf32> to vector<2x8x16xf32>
    %38 = arith.mulf %35, %37 : vector<2x8x16xf32>
    %39 = vector.extract_strided_slice %2 {offsets = [0, 32], sizes = [16, 16], strides = [1, 1]} : vector<16x192xf32> to vector<16x16xf32>
    %40 = vector.shape_cast %39 : vector<16x16xf32> to vector<2x8x16xf32>
    %41 = vector.extract_strided_slice %2 {offsets = [0, 96], sizes = [16, 16], strides = [1, 1]} : vector<16x192xf32> to vector<16x16xf32>
    %42 = vector.shape_cast %41 : vector<16x16xf32> to vector<2x8x16xf32>
    %43 = vector.extract_strided_slice %2 {offsets = [0, 160], sizes = [16, 16], strides = [1, 1]} : vector<16x192xf32> to vector<16x16xf32>
    %44 = vector.shape_cast %43 : vector<16x16xf32> to vector<2x8x16xf32>
    "tpu.trace_start"() <{level = 10 : i32, message = "bqd,bkd->bqk"}> : () -> ()
    %cst_11 = arith.constant dense<0.000000e+00> : vector<2x8x8xf32>
    %45 = tpu.matmul %40, %42, %cst_11 {dimension_numbers = #tpu.dot_dimension_numbers<[2], [2], [1], [1], [0, 0, 0, 1, 1, 1], [0], [0]>} : vector<2x8x16xf32>, vector<2x8x16xf32>, vector<2x8x8xf32> -> vector<2x8x8xf32>
    "tpu.trace_stop"() : () -> ()
    %cst_12 = arith.constant dense<0xFF800000> : vector<2x8xf32>
    %46 = vector.multi_reduction <maximumf>, %45, %cst_12 [2] : vector<2x8x8xf32> to vector<2x8xf32>
    %47 = vector.shape_cast %46 : vector<2x8xf32> to vector<2x8x1xf32>
    %48 = vector.broadcast %47 : vector<2x8x1xf32> to vector<2x8x8xf32>
    %49 = arith.subf %45, %48 : vector<2x8x8xf32>
    %50 = math.exp %49 : vector<2x8x8xf32>
    %cst_13 = arith.constant dense<0.000000e+00> : vector<2x8xf32>
    %51 = vector.multi_reduction <add>, %50, %cst_13 [2] : vector<2x8x8xf32> to vector<2x8xf32>
    %52 = vector.shape_cast %51 : vector<2x8xf32> to vector<2x8x1xf32>
    "tpu.trace_start"() <{level = 10 : i32, message = "bqk,bkd->bqd"}> : () -> ()
    %cst_14 = arith.constant dense<0.000000e+00> : vector<2x8x16xf32>
    %53 = tpu.matmul %50, %44, %cst_14 {dimension_numbers = #tpu.dot_dimension_numbers<[2], [1], [1], [2], [0, 0, 0, 1, 1, 2], [0], [0]>} : vector<2x8x8xf32>, vector<2x8x16xf32>, vector<2x8x16xf32> -> vector<2x8x16xf32>
    "tpu.trace_stop"() : () -> ()
    %54 = tpu.reciprocal %52 {approx = true} : vector<2x8x1xf32> -> vector<2x8x1xf32>
    %55 = vector.broadcast %54 : vector<2x8x1xf32> to vector<2x8x16xf32>
    %56 = arith.mulf %53, %55 : vector<2x8x16xf32>
    %57 = vector.extract_strided_slice %2 {offsets = [0, 48], sizes = [16, 16], strides = [1, 1]} : vector<16x192xf32> to vector<16x16xf32>
    %58 = vector.shape_cast %57 : vector<16x16xf32> to vector<2x8x16xf32>
    %59 = vector.extract_strided_slice %2 {offsets = [0, 112], sizes = [16, 16], strides = [1, 1]} : vector<16x192xf32> to vector<16x16xf32>
    %60 = vector.shape_cast %59 : vector<16x16xf32> to vector<2x8x16xf32>
    %61 = vector.extract_strided_slice %2 {offsets = [0, 176], sizes = [16, 16], strides = [1, 1]} : vector<16x192xf32> to vector<16x16xf32>
    %62 = vector.shape_cast %61 : vector<16x16xf32> to vector<2x8x16xf32>
    "tpu.trace_start"() <{level = 10 : i32, message = "bqd,bkd->bqk"}> : () -> ()
    %cst_15 = arith.constant dense<0.000000e+00> : vector<2x8x8xf32>
    %63 = tpu.matmul %58, %60, %cst_15 {dimension_numbers = #tpu.dot_dimension_numbers<[2], [2], [1], [1], [0, 0, 0, 1, 1, 1], [0], [0]>} : vector<2x8x16xf32>, vector<2x8x16xf32>, vector<2x8x8xf32> -> vector<2x8x8xf32>
    "tpu.trace_stop"() : () -> ()
    %cst_16 = arith.constant dense<0xFF800000> : vector<2x8xf32>
    %64 = vector.multi_reduction <maximumf>, %63, %cst_16 [2] : vector<2x8x8xf32> to vector<2x8xf32>
    %65 = vector.shape_cast %64 : vector<2x8xf32> to vector<2x8x1xf32>
    %66 = vector.broadcast %65 : vector<2x8x1xf32> to vector<2x8x8xf32>
    %67 = arith.subf %63, %66 : vector<2x8x8xf32>
    %68 = math.exp %67 : vector<2x8x8xf32>
    %cst_17 = arith.constant dense<0.000000e+00> : vector<2x8xf32>
    %69 = vector.multi_reduction <add>, %68, %cst_17 [2] : vector<2x8x8xf32> to vector<2x8xf32>
    %70 = vector.shape_cast %69 : vector<2x8xf32> to vector<2x8x1xf32>
    "tpu.trace_start"() <{level = 10 : i32, message = "bqk,bkd->bqd"}> : () -> ()
    %cst_18 = arith.constant dense<0.000000e+00> : vector<2x8x16xf32>
    %71 = tpu.matmul %68, %62, %cst_18 {dimension_numbers = #tpu.dot_dimension_numbers<[2], [1], [1], [2], [0, 0, 0, 1, 1, 2], [0], [0]>} : vector<2x8x8xf32>, vector<2x8x16xf32>, vector<2x8x16xf32> -> vector<2x8x16xf32>
    "tpu.trace_stop"() : () -> ()
    %72 = tpu.reciprocal %70 {approx = true} : vector<2x8x1xf32> -> vector<2x8x1xf32>
    %73 = vector.broadcast %72 : vector<2x8x1xf32> to vector<2x8x16xf32>
    %74 = arith.mulf %71, %73 : vector<2x8x16xf32>
    %75 = tpu.concatenate %20, %38, %56, %74 in 2 : vector<2x8x16xf32>, vector<2x8x16xf32>, vector<2x8x16xf32>, vector<2x8x16xf32> -> vector<2x8x64xf32>
    %76 = vector.shape_cast %75 : vector<2x8x64xf32> to vector<16x64xf32>
    %c0_19 = arith.constant 0 : index
    %c0_20 = arith.constant 0 : index
    %77 = vector.load %arg3[%c0_19, %c0_20] : memref<64x32xf32, #tpu.memory_space<vmem>>, vector<64x32xf32>
    %cst_21 = arith.constant dense<0.000000e+00> : vector<16x32xf32>
    %78 = tpu.matmul %76, %77, %cst_21 {dimension_numbers = #tpu.dot_dimension_numbers<[1], [0], [0], [1], [0, 0, 1, 1], [], []>} : vector<16x64xf32>, vector<64x32xf32>, vector<16x32xf32> -> vector<16x32xf32>
    %c0_22 = arith.constant 0 : index
    %c0_23 = arith.constant 0 : index
    %79 = vector.load %arg4[%c0_22, %c0_23] : memref<1x32xf32, #tpu.memory_space<vmem>>, vector<1x32xf32>
    %80 = vector.broadcast %79 : vector<1x32xf32> to vector<16x32xf32>
    %81 = arith.addf %78, %80 : vector<16x32xf32>
    %c0_24 = arith.constant 0 : index
    %c0_25 = arith.constant 0 : index
    %82 = vector.load %arg5[%c0_24, %c0_25] : memref<16x32xf32, #tpu.memory_space<vmem>>, vector<16x32xf32>
    tpu.vector_store %arg5[%c0_24, %c0_25], %81 {strides = array<i32>} : memref<16x32xf32, #tpu.memory_space<vmem>>, vector<16x32xf32>,
    return
  }
  func.func @transform_0(%arg0: i32) -> (i32, i32) {
    %c0_i32 = arith.constant 0 : i32
    %c0_i32_0 = arith.constant 0 : i32
    return %arg0, %c0_i32 : i32, i32
  }
  func.func @transform_1(%arg0: i32) -> (i32, i32) {
    %c0_i32 = arith.constant 0 : i32
    %c0_i32_0 = arith.constant 0 : i32
    %c0_i32_1 = arith.constant 0 : i32
    return %c0_i32, %c0_i32_0 : i32, i32
  }
  func.func @transform_2(%arg0: i32) -> (i32, i32) {
    %c0_i32 = arith.constant 0 : i32
    %c0_i32_0 = arith.constant 0 : i32
    %c0_i32_1 = arith.constant 0 : i32
    return %c0_i32, %c0_i32_0 : i32, i32
  }
  func.func @transform_3(%arg0: i32) -> (i32, i32) {
    %c0_i32 = arith.constant 0 : i32
    %c0_i32_0 = arith.constant 0 : i32
    %c0_i32_1 = arith.constant 0 : i32
    return %c0_i32, %c0_i32_0 : i32, i32
  }
  func.func @transform_4(%arg0: i32) -> (i32, i32) {
    %c0_i32 = arith.constant 0 : i32
    %c0_i32_0 = arith.constant 0 : i32
    return %arg0, %c0_i32 : i32, i32
  }
}

</mosaic_0001>

<bundles_post_ra>
// kernel: tpu_custom_call.1
= control target key start
LH: loop header
LB: loop body
LE: loop exit
PB: predicated region body
PF: predicated region fallthrough
CT: control target
= control target key end

     0   :  { %9 = vsyncpa [#allocation3], 0  ;;  %s2539_s0 = inlined_call_operand.vmem [shape: f32[32,32], index: 0, kind: input, shape index: {}]   ;;  %s2540_s1 = inlined_call_operand.vmem [shape: f32[32,192], index: 1, kind: input, shape index: {}]   ;;  %s2541_s2 = inlined_call_operand.vmem [shape: f32[64,32], index: 2, kind: input, shape index: {}]   ;;  %s2542_s3 = inlined_call_operand.vmem [shape: f32[1,32], index: 3, kind: input, shape index: {}]   ;;  %s2543_s4 = inlined_call_operand.hbm [shape: f32[32,32], index: 4, kind: output, shape index: {}]  }
   0x1   :  { %11 = vsyncpa [#allocation3 + $0x1], 0  ;;  %s2205_s15 = smov 0   ;;  %s2207_s16 = smov 0  }
   0x2   :  { %s2209_s17 = smov 0   ;;  %s2211_s18 = smov 0  }
   0x3 LB: > { %s2226_s19 = sadd.s32 4294967295, %s2166_s18   ;;  %s1815_s20 = sadd.s32 4294967294, %s2166_s18   ;;  %s2166_s18 = sphi %s2211_s18, %s2549_s18   ;;  %s2162_s17 = sphi %s2209_s17, %s2548_s17   ;;  %s2158_s16 = sphi %s2207_s16, %s2547_s16   ;;  %s2154_s15 = sphi %s2205_s15, %s2546_s15  }
   0x4   : > { %s2230_s21 = sadd.s32 1, %s2166_s18   ;;  %s113_s22 = sadd.s32 1, %s2162_s17 }
   0x5   : > { %s110_s23 = ssub.s32 %s2166_s18, %s2230_s21  ;;  %p123_p0 = scmp.ne.s32.totalorder %s2162_s17, %s2158_s16 }
   0x6   : > { %p111_p1 = scmp.eq.s32.totalorder %s110_s23, 0  ;;  %p124_p2 = scmp.eq.s32.totalorder %s2226_s19, 1 }
   0x7   : > { %p129_p3 = scmp.ne.s32.totalorder %s2158_s16, %s2154_s15  ;;  %p130_p4 = scmp.eq.s32.totalorder %s1815_s20, 1 }
   0x8   : > { %s2241_s24 = scalar_select %p111_p1, %s2162_s17, %s113_s22  }
   0x9   : > { %p2243_p5 = por %p124_p2, %p123_p0  ;;  %p2247_p6 = por %p130_p4, %p129_p3 }
   0xa   : > { %p1818_p7 = scmp.ge.s32.totalorder %s2166_s18, 1  ;;  %p166_p8 = scmp.lt.s32.totalorder %s2166_s18, 3 }
   0xc   : > { %p167_p9 = pnand %p1818_p7, %p166_p8 }
   0xd   : > { %v202_v0 = vld [vmem:[%s2540_s1 + $0x8] sm:$0xff] (!%p167_p9)  ;;  %v204_v1 = vld [vmem:[%s2540_s1 + $0x18] sm:$0xff] (!%p167_p9)  ;;  %v201_v2 = vld [vmem:[%s2540_s1] sm:$0xff] (!%p167_p9)  ;;  %s1820_s7 = sshll.u32 (!%p167_p9), %s2226_s19, 1  ;;  %v2168_v7 = vmov (!%p167_p9), 0.0   ;;  %vm209_vm0 = vcmask (!%p167_p9), 261120  }
   0xe   : > { %170 = sbr.rel (%p167_p9) target bundleno = 2411 (0x96b), region = 36  ;;  %v1998_v3 = vpack.c.bf16 (!%p167_p9), %v204_v1, %v202_v0  ;;  %v203_v4 = vld [vmem:[%s2540_s1 + $0x10] sm:$0xff] (!%p167_p9)  ;;  %v206_v5 = vld [vmem:[%s2540_s1 + $0x28] sm:$0xff] (!%p167_p9)  ;;  %v208_v6 = vld [vmem:[%s2540_s1 + $0x38] sm:$0xff] (!%p167_p9)  ;;  %280 = vmatprep.mubr.f32.mxu0 (!%p167_p9), %v2168_v7  ;;  %p193_p10 = scmp.lt.s32.totalorder (!%p167_p9), %s1820_s7, 3  ;;  %1904 = vmatprep.subr.mxu1 (!%p167_p9), %v2168_v7  ;;  %vm2169_vm1 = vmmov (!%p167_p9), 0  }
   0xf   : > { %v2000_v8 = vpack.c.bf16 (!%p167_p9), %v203_v4, %v201_v2  ;;  %v2002_v9 = vpack.c.bf16 (!%p167_p9), %v208_v6, %v206_v5  ;;  %v205_v10 = vld [vmem:[%s2540_s1 + $0x20] sm:$0xff] (!%p167_p9)  ;;  %v207_v11 = vld [vmem:[%s2540_s1 + $0x30] sm:$0xff] (!%p167_p9)  ;;  %1906 = vmatprep.mubr.msk.f32.mxu1 (!%p167_p9), %vm2169_vm1, %v2168_v7  ;;  %s2170_s5 = smov (!%p167_p9), 64   ;;  %s2171_s6 = smov (!%p167_p9), 48   ;;  %vm296_vm2 = vcmask (!%p167_p9), 130048   ;;  %vm448_vm3 = vcmask (!%p167_p9), 64512  }
  0x10   : > { %1999 = vmatprep.subr.bf16.mxu0 (!%p167_p9), %v1998_v3  ;;  %v2004_v12 = vpack.c.bf16 (!%p167_p9), %v207_v11, %v205_v10  ;;  %s2173_s8 = smov (!%p167_p9), 32   ;;  %s2174_s9 = smov (!%p167_p9), 96   ;;  %vm1637_vm4 = vcmask (!%p167_p9), 392192   ;;  %vm1655_vm5 = vcmask (!%p167_p9), 523264  }
  0x11   : > { %2001 = vmatpush1.bf16.msra.mxu0 (!%p167_p9), %v2000_v8  ;;  %s2175_s10 = smov (!%p167_p9), 16   ;;  %s2176_s11 = smov (!%p167_p9), 80  }
  0x12   : > { %2003 = vmatprep.subr.bf16.mxu0 (!%p167_p9), %v2002_v9  ;;  %s1856_s23 = sshll.u32 (!%p167_p9), %s2226_s19, 8 }
  0x13   : > { %s2494_s29 = scalar_lea.hbm (!%p167_p9), %s2543_s4, %s1856_s23 }
  0x15   : > { %s2551_s7 = smov (!%p193_p10, %s1820_s7), 3  ;;  %2005 = vmatpush1.bf16.msra.mxu0 %v2004_v12 }
  0x16   : > { %s1821_s27 = sshll.u32 %s2551_s7, 3  ;;  %1899 = vmatprep.subr.mxu0 %v2168_v7  ;;  %s2172_s7 = smov 112  }
  0x17   : > { %s196_s30 = scalar_lea.vmem %s2539_s0, %s1821_s27 }
  0x18   : > { %v199_v13 = vld [vmem:[%s196_s30] sm:$0xff]  ;;  %v200_v14 = vld [vmem:[%s196_s30 + $0x8] sm:$0xff] }
  0x19   : > { %1822 = vmatmul.mubr.msk.f32.vlgmr.msra.gmra.mrb[0].mxu0 %vm209_vm0, %v199_v13 }
  0x1a   : > { %286 = vmatprep.mubr.f32.mxu0 %v2168_v7 }
  0x1d   : > { %1823 = vmatmul.mubr.msk.f32.gmra.mrb[2].mxu0 %vm209_vm0, %v200_v14 }
  0x1e   : > { %1901 = vmatprep.mubr.msk.f32.mxu0 %vm2169_vm1, %v2168_v7 }
  0xec   : > { %v2291_v15 = vpop.f32.mrb[0].mxu0 }
  0xed   : > { %294 = vrot.lane.b32.xlu0 %v2291_v15, %s2170_s5  ;;  %v2294_v16 = vpop.f32.mrb[1].mxu0 }
  0xf0   : > { %v2296_v17 = vpop.f32.mrb[2].mxu0 }
  0xf1   : > { %372 = vrot.lane.b32.xlu0 %v2296_v17, %s2170_s5  ;;  %v2299_v18 = vpop.f32.mrb[3].mxu0  ;;  %s2177_s5 = smov [#allocation2]  }
  0xf5   : > { %619 = vrot.lane.b32.xlu0 %v2291_v15, %s2171_s6 }
  0xf9   : > { %617 = vrot.lane.b32.xlu0 %v2291_v15, %s2172_s7 }
  0xfd   : > { %695 = vrot.lane.b32.xlu0 %v2296_v17, %s2172_s7 }
 0x101   : > { %792 = vrot.lane.b32.xlu0 %v2294_v16, %s2172_s7 }
 0x105   : > { %951 = vrot.lane.b32.xlu0 %v2291_v15, %s2173_s8 }
 0x15f   : > { %v295_v19 = vpop.permute.xlu0 %294 }
 0x160   : > { %1900 = vmatpush3.xpose.msk.msra.mxu0 %vm296_vm2, %v295_v19 }
 0x161   : > { %1914 = vmatprep.subr.mxu0 %v2168_v7 }
 0x163   : > { %1902 = vmatmul.mubr.msk.f32.vlgmr.msra.gmra.mrb[4].mxu0 %vm296_vm2, %v2291_v15  ;;  %v373_v20 = vpop.permute.xlu0 %372 }
 0x164   : > { %1905 = vmatpush3.xpose.msk.msra.mxu1 %vm296_vm2, %v373_v20  ;;  %1915 = vmatpush3.msra.mxu0 %v2299_v18 }
 0x165   : > { %1909 = vmatprep.subr.mxu1 %v2168_v7  ;;  %1916 = vmatprep.mubr.msk.f32.mxu0 %vm2169_vm1, %v2168_v7 }
 0x166   : > { %1924 = vmatprep.subr.mxu0 %v2168_v7 }
 0x167   : > { %1907 = vmatmul.mubr.msk.f32.vlgmr.msra.gmra.mrb[0].mxu1 %vm296_vm2, %v2296_v17  ;;  %v620_v29 = vpop.permute.xlu0 %619 }
 0x168   : > { %1910 = vmatpush3.msra.mxu1 %v2294_v16  ;;  %1911 = vmatprep.mubr.msk.f32.mxu1 %vm2169_vm1, %v2168_v7 }
 0x169   : > { %1919 = vmatprep.subr.mxu1 %v2168_v7 }
 0x16b   : > { %v618_v34 = vpop.permute.xlu0 %617 }
 0x16f   : > { %v696_v35 = vpop.permute.xlu0 %695 }
 0x173   : > { %v793_v39 = vpop.permute.xlu0 %792 }
 0x177   : > { %v952_v51 = vpop.permute.xlu0 %951 }
 0x236   : > { %v367_v21 = vpop.f32.mrb[4].mxu0 }
 0x237   : > { %v1903_v22 = vpop.f32.mrb[5].mxu0  ;;  %v449_v23 = vsel %vm448_vm3, %v367_v21, -inf }
 0x238   : > { %450 = vmax.xlane.f32.xlu1 %v449_v23 }
 0x23a   : > { %v444_v24 = vpop.f32.mrb[0].mxu1 }
 0x23b   : > { %v1908_v25 = vpop.f32.mrb[1].mxu1  ;;  %v452_v26 = vsel %vm448_vm3, %v444_v24, -inf }
 0x23c   : > { %453 = vmax.xlane.f32.xlu1 %v452_v26 }
 0x24d   : > { %697 = vrot.lane.b32.xlu1 %v2296_v17, %s2171_s6 }
 0x251   : > { %869 = vrot.lane.b32.xlu1 %v2299_v18, %s2172_s7  ;;  %s2108_s7 = sshll.u32 %s2177_s5, 4  ;;  %s2109_s7 = int_to_ptr.vmem [resolvable:$false] %s2108_s7 }
 0x2c5   : > { %v451_v27 = vpop.xlane.xlu1 %450 }
 0x2c6   : > { %v455_v28 = vsub.f32 %v367_v21, %v451_v27 }
 0x2c8   : > { %v457_v30 = vmul.f32 1.442695, %v455_v28 }
 0x2c9   : > { %v454_v31 = vpop.xlane.xlu1 %453 }
 0x2ca   : > { %2072 = vpow2.f32 %v457_v30  ;;  %v456_v32 = vsub.f32 %v444_v24, %v454_v31 }
 0x2cc   : > { %v459_v33 = vmul.f32 1.442695, %v456_v32 }
 0x2cd   : > { %v698_v37 = vpop.permute.xlu1 %697 }
 0x2ce   : > { %2074 = vpow2.f32 %v459_v33 }
 0x2d1   : > { %v870_v40 = vpop.permute.xlu1 %869 }
 0x2d4   : > { %v2333_v36 = vpop.eup %2072 }
 0x2d5   : > { %1912 = vmatmul.mubr.msk.f32.vlgmr.msra.gmra.mrb[2].mxu1 %vm448_vm3, %v2333_v36 }
 0x2d6   : > { %1920 = vmatpush3.xpose.msk.msra.mxu1 %vm296_vm2, %v620_v29  ;;  %1921 = vmatprep.mubr.msk.f32.mxu1 %vm2169_vm1, %v2168_v7 }
 0x2d7   : > { %1929 = vmatprep.subr.mxu1 %v2168_v7 }
 0x2d8   : > { %v2341_v38 = vpop.eup %2074 }
 0x2d9   : > { %1917 = vmatmul.mubr.msk.f32.vlgmr.msra.gmra.mrb[6].mxu0 %vm448_vm3, %v2341_v38  ;;  %1922 = vmatmul.mubr.msk.f32.vlgmr.msra.gmra.mrb[4].mxu1 %vm296_vm2, %v618_v34 }
 0x2da   : > { %1925 = vmatpush3.xpose.msk.msra.mxu0 %vm296_vm2, %v698_v37  ;;  %1930 = vmatpush3.msra.mxu1 %v793_v39 }
 0x2db   : > { %1926 = vmatprep.mubr.msk.f32.mxu0 %vm2169_vm1, %v2168_v7  ;;  %1934 = vmatprep.subr.mxu0 %v2168_v7 }
 0x2dc   : > { %1931 = vmatprep.mubr.msk.f32.mxu1 %vm2169_vm1, %v2168_v7  ;;  %1939 = vmatprep.subr.mxu1 %v2168_v7 }
 0x2dd   : > { %1927 = vmatmul.mubr.msk.f32.vlgmr.msra.gmra.mrb[8].mxu0 %vm296_vm2, %v696_v35 }
 0x2de   : > { %1935 = vmatpush3.msra.mxu0 %v870_v40  ;;  %1936 = vmatprep.mubr.msk.f32.mxu0 %vm2169_vm1, %v2168_v7 }
 0x2df   : > { %1944 = vmatprep.subr.mxu0 %v2168_v7 }
 0x3a8   : > { %v2357_v41 = vpop.f32.mrb[2].mxu1 }
 0x3a9   : > { %v1913_v42 = vpop.f32.mrb[3].mxu1 }
 0x3ac   : > { %v2359_v43 = vpop.f32.mrb[6].mxu0  ;;  %v691_v44 = vpop.f32.mrb[4].mxu1 }
 0x3ad   : > { %v1918_v45 = vpop.f32.mrb[7].mxu0  ;;  %v1923_v46 = vpop.f32.mrb[5].mxu1  ;;  %v773_v47 = vsel %vm448_vm3, %v691_v44, -inf }
 0x3ae   : > { %774 = vmax.xlane.f32.xlu0 %v773_v47 }
 0x3b0   : > { %v769_v48 = vpop.f32.mrb[8].mxu0 }
 0x3b1   : > { %v1928_v49 = vpop.f32.mrb[9].mxu0  ;;  %v776_v50 = vsel %vm448_vm3, %v769_v48, -inf }
 0x3b2   : > { %777 = vmax.xlane.f32.xlu1 %v776_v50 }
 0x3c3   : > { %949 = vrot.lane.b32.xlu1 %v2291_v15, %s2174_s9 }
 0x3c4   : > { %1029 = vrot.lane.b32.xlu0 %v2296_v17, %s2173_s8 }
 0x3c7   : > { %1199 = vrot.lane.b32.xlu1 %v2299_v18, %s2174_s9 }
 0x3c8   : > { %1027 = vrot.lane.b32.xlu0 %v2296_v17, %s2174_s9 }
 0x3cb   : > { %1281 = vrot.lane.b32.xlu1 %v2291_v15, %s2175_s10 }
 0x3cc   : > { %1123 = vrot.lane.b32.xlu0 %v2294_v16, %s2174_s9 }
 0x43b   : > { %v775_v52 = vpop.xlane.xlu0 %774 }
 0x43c   : > { %v779_v53 = vsub.f32 %v691_v44, %v775_v52  ;;  %v461_v52 = vsel %vm448_vm3, %v2333_v36, 0.0 }
 0x43e   : > { %v781_v54 = vmul.f32 1.442695, %v779_v53 }
 0x43f   : > { %v778_v55 = vpop.xlane.xlu1 %777  ;;  %v1030_v58 = vpop.permute.xlu0 %1029 }
 0x440   : > { %2076 = vpow2.f32 %v781_v54  ;;  %v780_v56 = vsub.f32 %v769_v48, %v778_v55  ;;  %v464_v54 = vsel %vm448_vm3, %v2341_v38, 0.0 }
 0x442   : > { %v783_v57 = vmul.f32 1.442695, %v780_v56 }
 0x443   : > { %v1028_v59 = vpop.permute.xlu0 %1027  ;;  %v950_v61 = vpop.permute.xlu1 %949 }
 0x444   : > { %2078 = vpow2.f32 %v783_v57 }
 0x447   : > { %v1124_v63 = vpop.permute.xlu0 %1123  ;;  %v1200_v0 = vpop.permute.xlu1 %1199 }
 0x44a   : > { %v2371_v60 = vpop.eup %2076 }
 0x44b   : > { %1932 = vmatmul.mubr.msk.f32.vlgmr.msra.gmra.mrb[6].mxu1 %vm448_vm3, %v2371_v60  ;;  %v1282_v12 = vpop.permute.xlu1 %1281 }
 0x44c   : > { %1940 = vmatpush3.xpose.msk.msra.mxu1 %vm296_vm2, %v952_v51  ;;  %1941 = vmatprep.mubr.msk.f32.mxu1 %vm2169_vm1, %v2168_v7 }
 0x44d   : > { %1949 = vmatprep.subr.mxu1 %v2168_v7 }
 0x44e   : > { %v2379_v62 = vpop.eup %2078 }
 0x44f   : > { %1937 = vmatmul.mubr.msk.f32.vlgmr.msra.gmra.mrb[10].mxu0 %vm448_vm3, %v2379_v62  ;;  %1942 = vmatmul.mubr.msk.f32.vlgmr.msra.gmra.mrb[8].mxu1 %vm296_vm2, %v950_v61  ;;  %v788_v39 = vsel %vm448_vm3, %v2379_v62, 0.0 }
 0x450   : > { %1945 = vmatpush3.xpose.msk.msra.mxu0 %vm296_vm2, %v1030_v58  ;;  %1950 = vmatpush3.msra.mxu1 %v1124_v63 }
 0x451   : > { %1946 = vmatprep.mubr.msk.f32.mxu0 %vm2169_vm1, %v2168_v7  ;;  %1954 = vmatprep.subr.mxu0 %v2168_v7 }
 0x452   : > { %1951 = vmatprep.mubr.msk.f32.mxu1 %vm2169_vm1, %v2168_v7  ;;  %1959 = vmatprep.subr.mxu1 %v2168_v7 }
 0x453   : > { %1947 = vmatmul.mubr.msk.f32.vlgmr.msra.gmra.mrb[12].mxu0 %vm296_vm2, %v1028_v59 }
 0x454   : > { %1955 = vmatpush3.msra.mxu0 %v1200_v0  ;;  %1956 = vmatprep.mubr.msk.f32.mxu0 %vm2169_vm1, %v2168_v7 }
 0x455   : > { %1964 = vmatprep.subr.mxu0 %v2168_v7 }
 0x51e   : > { %v2395_v1 = vpop.f32.mrb[6].mxu1 }
 0x51f   : > { %v1933_v2 = vpop.f32.mrb[7].mxu1 }
 0x520   : > { %v1641_v2 = vld [vmem:[%s2541_s2 + $0x8] sm:$0xff] }
 0x522   : > { %v2397_v3 = vpop.f32.mrb[10].mxu0  ;;  %v1023_v4 = vpop.f32.mrb[8].mxu1 }
 0x523   : > { %v1938_v5 = vpop.f32.mrb[11].mxu0  ;;  %v1943_v6 = vpop.f32.mrb[9].mxu1  ;;  %v1105_v8 = vsel %vm448_vm3, %v1023_v4, -inf }
 0x524   : > { %1106 = vmax.xlane.f32.xlu1 %v1105_v8  ;;  %v1643_v5 = vld [vmem:[%s2541_s2 + $0x18] sm:$0xff]  ;;  %v1644_v8 = vld [vmem:[%s2541_s2 + $0x20] sm:$0xff] }
 0x526   : > { %v1101_v9 = vpop.f32.mrb[12].mxu0 }
 0x527   : > { %v1948_v10 = vpop.f32.mrb[13].mxu0  ;;  %v1108_v11 = vsel %vm448_vm3, %v1101_v9, -inf }
 0x528   : > { %1109 = vmax.xlane.f32.xlu0 %v1108_v11 }
 0x535   : > { %1279 = vrot.lane.b32.xlu1 %v2291_v15, %s2176_s11 }
 0x53e   : > { %1359 = vrot.lane.b32.xlu0 %v2296_v17, %s2175_s10 }
 0x542   : > { %1357 = vrot.lane.b32.xlu0 %v2296_v17, %s2176_s11 }
 0x5b1   : > { %v1107_v13 = vpop.xlane.xlu1 %1106 }
 0x5b2   : > { %v1111_v14 = vsub.f32 %v1023_v4, %v1107_v13  ;;  %v1647_v13 = vld [vmem:[%s2541_s2 + $0x38] sm:$0xff] }
 0x5b4   : > { %v1113_v19 = vmul.f32 1.442695, %v1111_v14 }
 0x5b5   : > { %v1110_v20 = vpop.xlane.xlu0 %1109  ;;  %v1280_v17 = vpop.permute.xlu1 %1279 }
 0x5b6   : > { %2080 = vpow2.f32 %v1113_v19  ;;  %v1112_v21 = vsub.f32 %v1101_v9, %v1110_v20  ;;  %v1645_v9 = vld [vmem:[%s2541_s2 + $0x28] sm:$0xff] }
 0x5b7   : > { %v2014_v10 = vpack.c.bf16 %v1645_v9, %v1644_v8 }
 0x5b8   : > { %v1115_v22 = vmul.f32 1.442695, %v1112_v21 }
 0x5b9   : > { %v1360_v24 = vpop.permute.xlu0 %1359 }
 0x5ba   : > { %2082 = vpow2.f32 %v1115_v22 }
 0x5bd   : > { %v1358_v25 = vpop.permute.xlu0 %1357 }
 0x5c0   : > { %v2081_v23 = vpop.eup %2080 }
 0x5c1   : > { %1952 = vmatmul.mubr.msk.f32.vlgmr.msra.gmra.mrb[10].mxu1 %vm448_vm3, %v2081_v23  ;;  %v1117_v40 = vsel %vm448_vm3, %v2081_v23, 0.0 }
 0x5c2   : > { %1960 = vmatpush3.xpose.msk.msra.mxu1 %vm296_vm2, %v1282_v12  ;;  %1961 = vmatprep.mubr.msk.f32.mxu1 %vm2169_vm1, %v2168_v7  ;;  %v1646_v12 = vld [vmem:[%s2541_s2 + $0x30] sm:$0xff] }
 0x5c3   : > { %1969 = vmatprep.subr.mxu1 %v2168_v7  ;;  %v2018_v14 = vpack.c.bf16 %v1647_v13, %v1646_v12 }
 0x5c4   : > { %v2083_v15 = vpop.eup %2082 }
 0x5c5   : > { %1957 = vmatmul.mubr.msk.f32.vlgmr.msra.gmra.mrb[14].mxu0 %vm448_vm3, %v2083_v15  ;;  %1962 = vmatmul.mubr.msk.f32.vlgmr.msra.gmra.mrb[12].mxu1 %vm296_vm2, %v1280_v17  ;;  %v1120_v37 = vsel %vm448_vm3, %v2083_v15, 0.0 }
 0x5c6   : > { %1965 = vmatpush3.xpose.msk.msra.mxu0 %vm296_vm2, %v1360_v24  ;;  %1966 = vmatprep.mubr.msk.f32.mxu0 %vm2169_vm1, %v2168_v7 }
 0x5c7   : > { %1974 = vmatprep.subr.mxu0 %v2168_v7  ;;  %1971 = vmatprep.mubr.msk.f32.mxu1 %vm2169_vm1, %v2168_v7 }
 0x5c9   : > { %1967 = vmatmul.mubr.msk.f32.vlgmr.msra.gmra.mrb[16].mxu0 %vm296_vm2, %v1358_v25 }
 0x5ca   : > { %1976 = vmatprep.mubr.msk.f32.mxu0 %vm2169_vm1, %v2168_v7  ;;  %v785_v7 = vsel %vm448_vm3, %v2371_v60, 0.0 }
 0x694   : > { %v2423_v26 = vpop.f32.mrb[10].mxu1 }
 0x695   : > { %v1953_v27 = vpop.f32.mrb[11].mxu1 }
 0x698   : > { %v1271_v28 = vpop.f32.mrb[14].mxu0  ;;  %v1353_v29 = vpop.f32.mrb[12].mxu1 }
 0x699   : > { %v1958_v30 = vpop.f32.mrb[15].mxu0  ;;  %v1963_v31 = vpop.f32.mrb[13].mxu1  ;;  %v1435_v32 = vsel %vm448_vm3, %v1353_v29, -inf }
 0x69a   : > { %1436 = vmax.xlane.f32.xlu1 %v1435_v32 }
 0x69c   : > { %v1431_v33 = vpop.f32.mrb[16].mxu0 }
 0x69d   : > { %v1968_v34 = vpop.f32.mrb[17].mxu0  ;;  %v1438_v35 = vsel %vm448_vm3, %v1431_v33, -inf }
 0x69e   : > { %1439 = vmax.xlane.f32.xlu0 %v1438_v35 }
 0x6ab   : > { %1529 = vrot.lane.b32.xlu1 %v2299_v18, %s2176_s11 }
 0x6b4   : > { %1453 = vrot.lane.b32.xlu0 %v2294_v16, %s2176_s11 }
 0x6cf   : > { %786 = vadd.xlane.f32.xlu1 %v785_v7 }
 0x6d3   : > { %1121 = vadd.xlane.f32.xlu1 %v1120_v37  ;;  %789 = vadd.xlane.f32.xlu0 %v788_v39 }
 0x6d7   : > { %1118 = vadd.xlane.f32.xlu0 %v1117_v40 }
 0x727   : > { %v1437_v42 = vpop.xlane.xlu1 %1436 }
 0x728   : > { %v1441_v44 = vsub.f32 %v1353_v29, %v1437_v42 }
 0x72a   : > { %v1443_v18 = vmul.f32 1.442695, %v1441_v44 }
 0x72b   : > { %v1530_v45 = vpop.permute.xlu1 %1529  ;;  %v1440_v46 = vpop.xlane.xlu0 %1439 }
 0x72c   : > { %2084 = vpow2.f32 %v1443_v18  ;;  %v1442_v16 = vsub.f32 %v1431_v33, %v1440_v46  ;;  %1975 = vmatpush3.msra.mxu0 %v1530_v45 }
 0x72e   : > { %v1445_v47 = vmul.f32 1.442695, %v1442_v16 }
 0x72f   : > { %v1454_v48 = vpop.permute.xlu0 %1453 }
 0x730   : > { %2086 = vpow2.f32 %v1445_v47  ;;  %1970 = vmatpush3.msra.mxu1 %v1454_v48 }
 0x736   : > { %v2085_v49 = vpop.eup %2084 }
 0x737   : > { %1972 = vmatmul.mubr.msk.f32.vlgmr.msra.gmra.mrb[14].mxu1 %vm448_vm3, %v2085_v49  ;;  %v1447_v50 = vsel %vm448_vm3, %v2085_v49, 0.0 }
 0x738   : > { %1448 = vadd.xlane.f32.xlu0 %v1447_v50 }
 0x73a   : > { %v2087_v51 = vpop.eup %2086 }
 0x73b   : > { %1977 = vmatmul.mubr.msk.f32.vlgmr.msra.gmra.mrb[18].mxu0 %vm448_vm3, %v2087_v51  ;;  %v1450_v53 = vsel %vm448_vm3, %v2087_v51, 0.0 }
 0x73c   : > { %462 = vadd.xlane.f32.xlu0 %v461_v52  ;;  %1451 = vadd.xlane.f32.xlu1 %v1450_v53 }
 0x740   : > { %465 = vadd.xlane.f32.xlu1 %v464_v54 }
 0x75c   : > { %v787_v55 = vpop.xlane.xlu1 %786 }
 0x75d   : > { %2088 = vrcp.f32 %v787_v55 }
 0x760   : > { %v1122_v56 = vpop.xlane.xlu1 %1121  ;;  %v790_v57 = vpop.xlane.xlu0 %789 }
 0x761   : > { %2090 = vrcp.f32 %v1122_v56 }
 0x762   : > { %2092 = vrcp.f32 %v790_v57 }
 0x764   : > { %v1119_v58 = vpop.xlane.xlu0 %1118 }
 0x765   : > { %2094 = vrcp.f32 %v1119_v58 }
 0x767   : > { %v2089_v59 = vpop.eup %2088 }
 0x768   : > { %v947_v60 = vmul.f32 %v2089_v59, %v2395_v1  ;;  %v1640_v1 = vld [vmem:[%s2541_s2] sm:$0xff] }
 0x769   : > { %v2006_v4 = vpack.c.bf16 %v1641_v2, %v1640_v1 }
 0x76a   : > { %1611 = vrot.lane.b32.xlu0 %v947_v60, %s2175_s10 }
 0x76b   : > { %v2091_v36 = vpop.eup %2090  ;;  %2007 = vmatprep.subr.bf16.mxu1 %v2006_v4 }
 0x76c   : > { %v2093_v61 = vpop.eup %2092  ;;  %v1278_v62 = vmul.f32 %v2091_v36, %v1271_v28  ;;  %2009 = vmatpush3.bf16.msra.mxu1 %v2006_v4 }
 0x76d   : > { %v948_v63 = vmul.f32 %v2093_v61, %v2397_v3  ;;  %v1642_v3 = vld [vmem:[%s2541_s2 + $0x10] sm:$0xff] }
 0x76e   : > { %1621 = vrot.lane.b32.xlu0 %v1278_v62, %s2173_s8  ;;  %v2010_v6 = vpack.c.bf16 %v1643_v5, %v1642_v3 }
 0x76f   : > { %v2095_v38 = vpop.eup %2094  ;;  %1613 = vrot.lane.b32.xlu1 %v948_v63, %s2175_s10 }
 0x770   : > { %v1277_v0 = vmul.f32 %v2095_v38, %v2423_v26  ;;  %2011 = vmatprep.subr.bf16.mxu1 %v2010_v6 }
 0x771   : > { %2013 = vmatpush3.bf16.msra.mxu1 %v2010_v6 }
 0x772   : > { %2015 = vmatprep.subr.bf16.mxu1 %v2014_v10 }
 0x773   : > { %1619 = vrot.lane.b32.xlu1 %v1277_v0, %s2173_s8  ;;  %s2110_s8 = scalar_lea.vmem %s2109_s7, 512 }
 0x775   : > { %2017 = vmatpush3.bf16.msra.mxu1 %v2014_v10 }
 0x776   : > { %2019 = vmatprep.subr.bf16.mxu1 %v2018_v14 }
 0x779   : > { %2021 = vmatpush3.bf16.msra.mxu1 %v2018_v14 }
 0x7c5   : > { %v1449_v11 = vpop.xlane.xlu0 %1448 }
 0x7c6   : > { %2096 = vrcp.f32 %v1449_v11 }
 0x7c9   : > { %v1452_v19 = vpop.xlane.xlu1 %1451  ;;  %v463_v26 = vpop.xlane.xlu0 %462 }
 0x7ca   : > { %2098 = vrcp.f32 %v1452_v19 }
 0x7cb   : > { %2100 = vrcp.f32 %v463_v26 }
 0x7cd   : > { %v466_v27 = vpop.xlane.xlu1 %465 }
 0x7ce   : > { %2102 = vrcp.f32 %v466_v27 }
 0x7d0   : > { %v2097_v20 = vpop.eup %2096 }
 0x7d4   : > { %v2099_v24 = vpop.eup %2098 }
 0x7d5   : > { %v2101_v29 = vpop.eup %2100 }
 0x7d6   : > { %v615_v33 = vmul.f32 %v2101_v29, %v2357_v41  ;;  %v1848_v41 = vld [vmem:[%s2542_s3] ss:$0 sm:$0xff] }
 0x7d8   : > { %v2103_v31 = vpop.eup %2102 }
 0x7d9   : > { %v616_v35 = vmul.f32 %v2103_v31, %v2359_v43 }
 0x7dc   : > { %v1612_v30 = vpop.permute.xlu0 %1611 }
 0x7dd   : > { %v1633_v34 = vsel %vm296_vm2, %v615_v33, %v1612_v30 }
 0x7e0   : > { %v1622_v7 = vpop.permute.xlu0 %1621 }
 0x7e1   : > { %v1614_v28 = vpop.permute.xlu1 %1613 }
 0x7e2   : > { %v1634_v40 = vsel %vm296_vm2, %v616_v35, %v1614_v28 }
 0x7e3   : > { %v1636_v44 = vsel %vm209_vm0, %v1634_v40, %v1622_v7 }
 0x7e5   : > { %v1620_v32 = vpop.permute.xlu1 %1619 }
 0x7e6   : > { %v1635_v37 = vsel %vm209_vm0, %v1633_v34, %v1620_v32 }
 0x80a   : > { %v1525_v21 = vpop.f32.mrb[14].mxu1 }
 0x80b   : > { %v1607_v22 = vmul.f32 %v2097_v20, %v1525_v21  ;;  %v1973_v23 = vpop.f32.mrb[15].mxu1 }
 0x80d   : > { %1627 = vrot.lane.b32.xlu1 %v1607_v22, %s2171_s6 }
 0x80e   : > { %v1601_v15 = vpop.f32.mrb[18].mxu0 }
 0x80f   : > { %v1608_v17 = vmul.f32 %v2099_v24, %v1601_v15  ;;  %v1978_v25 = vpop.f32.mrb[19].mxu0 }
 0x811   : > { %1629 = vrot.lane.b32.xlu0 %v1608_v17, %s2171_s6  ;;  %s189_s6 = sand.u32 1, %s2158_s16  }
 0x812   : > { %s1819_s12 = sshll.u32 %s189_s6, 4  ;;  %s2498_s30 = scalar_lea.sflag [#allocation3], %s189_s6 }
 0x813   : > { %s191_s20 = scalar_lea.vmem [#allocation2], %s1819_s12 }
 0x814   : > { %s1753_s22 = sshll.u32 %s191_s20, 4  ;;  %s2489_s22 = int_to_ptr.vmem [resolvable:$true] %s1753_s22 }
 0x815   : > { %s2104_s19 = scalar_lea.vmem %s2489_s22, 256  ;;  %p2111_p0 = scmp.lt.s32.totalorder %s2489_s22, %s2109_s7 }
 0x816   : > { %p2105_p11 = scmp.ne.s32.totalorder %s2489_s22, %s2104_s19  ;;  %p2112_p1 = scmp.lt.s32.totalorder %s2110_s8, %s2104_s19 }
 0x818   : > { %p2106_p12 = pnand %p2105_p11, %p2243_p5  ;;  %p2113_p2 = por %p2112_p1, %p2111_p0 }
 0x81a   : > { %p2107_p13 = pneg %p2106_p12 }
 0x81c   : > { %p2114_p3 = pnand %p2113_p2, %p2107_p13 }
 0x87f   : > { %v1628_v39 = vpop.permute.xlu1 %1627 }
 0x880   : > { %v1638_v42 = vsel %vm1637_vm4, %v1635_v37, %v1628_v39 }
 0x881   : > { %1995 = vmatprep.mubr.msk.f32.mxu1 %vm1655_vm5, %v1638_v42 }
 0x883   : > { %v1630_v18 = vpop.permute.xlu0 %1629 }
 0x884   : > { %v1639_v45 = vsel %vm1637_vm4, %v1636_v44, %v1630_v18 }
 0x885   : > { %1996 = vmatmul.mubr.msk.f32.vlgmr.msra.gmra.mrb[16].mxu1 %vm1655_vm5, %v1639_v45 }
 0x958   : > { %v1997_v43 = vpop.f32.mrb[16].mxu1 }
 0x959   : > { %v1734_v46 = vadd.f32 %v1997_v43, %v1848_v41  ;;  %v1728_v16 = vpop.f32.mrb[17].mxu1 }
 0x95a   : > { %v1729_v47 = vadd.f32 %v1848_v41, %v1728_v16 }
 0x95b   : > { %1738 = vst.msk [vmem:[%s191_s20 + $0x8] sm:$0xff] %vm209_vm0, %v1734_v46 }
 0x95c   : > { %1737 = vst.msk [vmem:[%s191_s20] sm:$0xff] %vm209_vm0, %v1729_v47 }
 0x95d   : > { %2117 = shalt.err (!%p2114_p3)
}
 0x95e   : > { %s2118_s9 = scalar_lea.hbm %s2494_s29, 256  ;;  %s2122_s6 = scalar_lea.hbm %s2543_s4, 512 }
 0x95f   : > { %p2119_p4 = scmp.ne.s32.totalorder %s2494_s29, %s2118_s9  ;;  %p2123_p9 = scmp.lt.u32.totalorder %s2494_s29, %s2543_s4 }
 0x960   : > { %p2124_p10 = scmp.lt.u32.totalorder %s2122_s6, %s2118_s9  ;;  %p2126_p12 = scmp.lt.u32.totalorder %s2118_s9, %s2494_s29 }
 0x961   : > { %p2120_p7 = pnand %p2119_p4, %p2243_p5 }
 0x962   : > { %p2125_p11 = por %p2124_p10, %p2123_p9 }
 0x963   : > { %p2121_p8 = pneg %p2120_p7 }
 0x964   : > { %p2127_p13 = por %p2126_p12, %p2125_p11 }
 0x966   : > { %p2128_p0 = pnand %p2127_p13, %p2121_p8 }
 0x968   : > { %2131 = shalt.err (!%p2128_p0)
}
 0x969   : > { %s2178_s14 = smov 128   ;;  %s2179_s20 = smov 8  }
 0x96a   : > { %2022 = dma.vmem_to_hbm [thread:$0]  (%p2243_p5), %s2489_s22, 256, %s2494_s29, %s2498_s30, %s2178_s14, %s2178_s14, %s2179_s20  }
 0x96b PF: > { %p2028_p1 = scmp.ge.s32.totalorder %s2166_s18, 2  ;;  %s1768_s23 = sand.u32 1, %s2154_s15  }
 0x96c   : > { %s1769_s27 = scalar_lea.sflag [#allocation3], %s1768_s23 }
 0x96d   : > { %p2025_p2 = pnand %p2028_p1, %p2247_p6 }
 0x96f   : > { %2149 = dma.done.wait (!%p2025_p2), %s1769_s27, 256  }
 0x970   : > { %2151 = vsyncadd (!%p2025_p2), %s1769_s27, 4294967040  ;;  %p14_p3 = scmp.ge.s32.totalorder %s2230_s21, 4   ;;  %s2546_s15 = smov %s2158_s16 }
 0x971   : > { %s2547_s16 = smov %s2162_s17  ;;  %s2548_s17 = smov %s2241_s24 }
 0x972   : > { %s2549_s18 = smov %s2230_s21  ;;  %16 = sbr.rel (!%p14_p3) target bundleno = 3 (0x3), region = 71 }
 0x979   :  { %1774 = vsyncpa [#allocation3], 1 }
 0x97a   :  { %1776 = vsyncpa [#allocation3 + $0x1], 1 }

</bundles_post_ra>
